<compile_context>
chip_gen: v7x
topology: tpu7x:2x2x1
jax: 0.10.0
libtpu: 0.0.40
codegen_flags: <defaults>
</compile_context>

<pallas_src>
import functools
import numpy as np
import jax
import jax.numpy as jnp
from jax.experimental import pallas as pl
from jax.experimental.pallas import tpu as pltpu


NUM_FREQS = 20
MAX_FREQ = 10.0
INCLUDE_IN = True
# Deterministic non-trainable "parameter", identical to the PyTorch __init__.
FREQS = 2.0 ** np.linspace(0.0, MAX_FREQ, NUM_FREQS).astype(np.float32)


def _round_up(x, m):
    return (x + m - 1) // m * m


def _embedding_kernel(x_ref, rep_ref, fr_ref, o_ref, *, c, fc, include_in):
    # x_ref: (tn, C); rep_ref: (C, F*C) one-hot; fr_ref: (1, F*C) repeated freqs.
    # o_ref: (tn, C*include_in + 2*F*C).
    x = x_ref[...]
    # Lane-densify on the MXU: column j*C + ci of xt is x[:, ci].  R is one-hot
    # (0/1, exactly representable), precision=HIGHEST keeps the copy bit-exact.
    xt = jnp.dot(
        x,
        rep_ref[...],
        precision=jax.lax.Precision.HIGHEST,
        preferred_element_type=jnp.float32,
    )
    # Exact f32 multiply on the VPU (same rounding as the reference x * freq).
    xf = xt * fr_ref[...]
    base = c if include_in else 0
    if include_in:
        o_ref[:, 0:c] = x.astype(o_ref.dtype)
    o_ref[:, base:base + fc] = jnp.sin(xf).astype(o_ref.dtype)            # sin(f0..fF-1)
    o_ref[:, base + fc:base + 2 * fc] = jnp.cos(xf).astype(o_ref.dtype)   # cos(f0..fF-1)


def embedding_module_log(x, *, freqs=FREQS, include_in=INCLUDE_IN, tile_n=4096):
    """x: (N, C). Returns (N, C * (include_in + 2 * len(freqs)))."""
    n, c = x.shape
    freqs = np.asarray(freqs, dtype=np.float32)
    num_freqs = int(freqs.shape[0])
    fc = num_freqs * c
    out_c = c * int(include_in) + 2 * fc

    # Constant tables passed as kernel *inputs* (not captured constants).
    freq_row = jnp.asarray(np.repeat(freqs, c)[None, :])                       # (1, F*C)
    rep = jnp.asarray(np.tile(np.eye(c, dtype=np.float32), (1, num_freqs)))    # (C, F*C)

    # Tile along N only; the channel axis stays whole (block dim == full array
    # dim, so the tiny channel width has no 128-lane divisibility requirement).
    # Cap the tile at ~N/2 so there are >=2 grid steps (v7x has 2 TensorCores).
    half_cap = _round_up(max((n + 1) // 2, 1), 8)
    tn = _round_up(max(min(int(tile_n), half_cap), 8), 8)
    n_pad = _round_up(n, tn)
    x_p = jnp.pad(x, ((0, n_pad - n), (0, 0))) if n_pad != n else x

    # VMEM budget: double-buffered input (lane-padded to 128) + output tile
    # + xt/xf/sin/cos temps, with ~2x headroom; clamped under v7x's 64 MiB
    # physical VMEM and above v5e's 16 MiB scoped default.
    lane = 128
    in_blk = tn * lane * 4
    out_blk = tn * _round_up(out_c, lane) * 4
    tmp_blk = tn * _round_up(fc, lane) * 4
    vmem_limit = 2 * (2 * in_blk + 2 * out_blk + 6 * tmp_blk)
    vmem_limit = int(min(max(vmem_limit, 32 * 1024 * 1024), 56 * 1024 * 1024))

    kernel = functools.partial(_embedding_kernel, c=c, fc=fc, include_in=include_in)
    out = pl.pallas_call(
        kernel,
        out_shape=jax.ShapeDtypeStruct((n_pad, out_c), x.dtype),
        grid_spec=pltpu.PrefetchScalarGridSpec(
            num_scalar_prefetch=0,
            grid=(n_pad // tn,),
            in_specs=[
                pl.BlockSpec((tn, c), lambda i: (i, 0)),    # x tile
                pl.BlockSpec((c, fc), lambda i: (0, 0)),    # one-hot replication matrix
                pl.BlockSpec((1, fc), lambda i: (0, 0)),    # repeated-freq row
            ],
            out_specs=pl.BlockSpec((tn, out_c), lambda i: (i, 0)),
        ),
        compiler_params=pltpu.CompilerParams(
            dimension_semantics=("parallel",),
            vmem_limit_bytes=vmem_limit,
        ),
    )(x_p, rep, freq_row)
    return out[:n] if n_pad != n else out


def _reference(x, freqs=FREQS, include_in=INCLUDE_IN):
    outs = [x] if include_in else []
    for f in freqs:
        outs.append(jnp.sin(x * float(f)))
    for f in freqs:
        outs.append(jnp.cos(x * float(f)))
    return jnp.concatenate(outs, axis=1)


if __name__ == "__main__":
    key = jax.random.PRNGKey(0)
    # Small shapes: (batch=2 * seq=8) = 16 flattened points, 4 input channels.
    x = jax.random.normal(key, (16, 4), dtype=jnp.float32)
    out = jax.block_until_ready(embedding_module_log(x))
    ref = _reference(x)
    assert out.shape == (16, 4 * (1 + 2 * NUM_FREQS)), out.shape
    np.testing.assert_allclose(np.asarray(out), np.asarray(ref), rtol=1e-5, atol=1e-5)

    # Exercise the multi-tile + padding path (N not a multiple of the tile, C=3).
    x2 = jax.random.normal(jax.random.PRNGKey(1), (100, 3), dtype=jnp.float32)
    out2 = jax.block_until_ready(embedding_module_log(x2, tile_n=32))
    ref2 = _reference(x2)
    assert out2.shape == (100, 3 * (1 + 2 * NUM_FREQS)), out2.shape
    np.testing.assert_allclose(np.asarray(out2), np.asarray(ref2), rtol=1e-5, atol=1e-5)

    print("KERNEL_OK")
</pallas_src>

<mosaic_0001>
module attributes {stable_mosaic.version = 11 : i64} {
  func.func @_embedding_kernel(%arg0: i32, %arg1: memref<8x4xf32, #tpu.memory_space<vmem>>, %arg2: memref<4x80xf32, #tpu.memory_space<vmem>>, %arg3: memref<1x80xf32, #tpu.memory_space<vmem>>, %arg4: memref<8x164xf32, #tpu.memory_space<vmem>>) attributes {dimension_semantics = [#tpu.dimension_semantics<parallel>], iteration_bounds = array<i64: 2>, scalar_prefetch = 0 : i64, scratch_operands = 0 : i64, tpu.core_type = #tpu.core_type<tc>, window_params = [{transform_indices = @transform_0, window_bounds = array<i64: 8, 4>}, {pipeline_mode = #tpu.pipeline_mode<synchronous>, transform_indices = @transform_1, window_bounds = array<i64: 4, 80>}, {pipeline_mode = #tpu.pipeline_mode<synchronous>, transform_indices = @transform_2, window_bounds = array<i64: 1, 80>}, {transform_indices = @transform_3, window_bounds = array<i64: 8, 164>}]} {
    %c0 = arith.constant 0 : index
    %c0_0 = arith.constant 0 : index
    %0 = vector.load %arg1[%c0, %c0_0] : memref<8x4xf32, #tpu.memory_space<vmem>>, vector<8x4xf32>
    %c0_1 = arith.constant 0 : index
    %c0_2 = arith.constant 0 : index
    %1 = vector.load %arg2[%c0_1, %c0_2] : memref<4x80xf32, #tpu.memory_space<vmem>>, vector<4x80xf32>
    %cst = arith.constant dense<0.000000e+00> : vector<8x80xf32>
    %2 = tpu.matmul %0, %1, %cst {dimension_numbers = #tpu.dot_dimension_numbers<[1], [0], [0], [1], [0, 0, 1, 1], [], []>, precision = #tpu.contract_precision<fp32>} : vector<8x4xf32>, vector<4x80xf32>, vector<8x80xf32> -> vector<8x80xf32>
    %c0_3 = arith.constant 0 : index
    %c0_4 = arith.constant 0 : index
    %3 = vector.load %arg3[%c0_3, %c0_4] : memref<1x80xf32, #tpu.memory_space<vmem>>, vector<1x80xf32>
    %4 = vector.broadcast %3 : vector<1x80xf32> to vector<8x80xf32>
    %5 = arith.mulf %2, %4 : vector<8x80xf32>
    %c0_5 = arith.constant 0 : index
    %c0_6 = arith.constant 0 : index
    %6 = vector.load %arg4[%c0_5, %c0_6] : memref<8x164xf32, #tpu.memory_space<vmem>>, vector<8x4xf32>
    tpu.vector_store %arg4[%c0_5, %c0_6], %0 {strides = array<i32>} : memref<8x164xf32, #tpu.memory_space<vmem>>, vector<8x4xf32>,
    %7 = math.sin %5 : vector<8x80xf32>
    %c0_7 = arith.constant 0 : index
    %c4 = arith.constant 4 : index
    %8 = vector.load %arg4[%c0_7, %c4] : memref<8x164xf32, #tpu.memory_space<vmem>>, vector<8x80xf32>
    tpu.vector_store %arg4[%c0_7, %c4], %7 {strides = array<i32>} : memref<8x164xf32, #tpu.memory_space<vmem>>, vector<8x80xf32>,
    %9 = math.cos %5 : vector<8x80xf32>
    %c0_8 = arith.constant 0 : index
    %c84 = arith.constant 84 : index
    %10 = vector.load %arg4[%c0_8, %c84] : memref<8x164xf32, #tpu.memory_space<vmem>>, vector<8x80xf32>
    tpu.vector_store %arg4[%c0_8, %c84], %9 {strides = array<i32>} : memref<8x164xf32, #tpu.memory_space<vmem>>, vector<8x80xf32>,
    return
  }
  func.func @transform_0(%arg0: i32) -> (i32, i32) {
    %c0_i32 = arith.constant 0 : i32
    %c0_i32_0 = arith.constant 0 : i32
    return %arg0, %c0_i32 : i32, i32
  }
  func.func @transform_1(%arg0: i32) -> (i32, i32) {
    %c0_i32 = arith.constant 0 : i32
    %c0_i32_0 = arith.constant 0 : i32
    %c0_i32_1 = arith.constant 0 : i32
    return %c0_i32, %c0_i32_0 : i32, i32
  }
  func.func @transform_2(%arg0: i32) -> (i32, i32) {
    %c0_i32 = arith.constant 0 : i32
    %c0_i32_0 = arith.constant 0 : i32
    %c0_i32_1 = arith.constant 0 : i32
    return %c0_i32, %c0_i32_0 : i32, i32
  }
  func.func @transform_3(%arg0: i32) -> (i32, i32) {
    %c0_i32 = arith.constant 0 : i32
    %c0_i32_0 = arith.constant 0 : i32
    return %arg0, %c0_i32 : i32, i32
  }
}

</mosaic_0001>

<bundles_post_ra>
// kernel: tpu_custom_call.1
= control target key start
LH: loop header
LB: loop body
LE: loop exit
PB: predicated region body
PF: predicated region fallthrough
CT: control target
= control target key end

     0   :  { %8 = vsyncpa [#allocation3], 0  ;;  %s1300_s0 = inlined_call_operand.vmem [shape: f32[16,4], index: 0, kind: input, shape index: {}]   ;;  %s1301_s1 = inlined_call_operand.vmem [shape: f32[4,80], index: 1, kind: input, shape index: {}]   ;;  %s1302_s2 = inlined_call_operand.vmem [shape: f32[1,80], index: 2, kind: input, shape index: {}]   ;;  %s1303_s3 = inlined_call_operand.hbm [shape: f32[16,164], index: 3, kind: output, shape index: {}]  }
   0x1   :  { %10 = vsyncpa [#allocation3 + $0x1], 0  ;;  %s1150_s12 = smov 0   ;;  %s1152_s13 = smov 0  }
   0x2   :  { %s1154_s14 = smov 0   ;;  %s1156_s15 = smov 0  }
   0x3 LB: > { %s1171_s16 = sadd.s32 4294967295, %s1117_s15   ;;  %s926_s17 = sadd.s32 4294967294, %s1117_s15   ;;  %s1117_s15 = sphi %s1156_s15, %s1309_s15   ;;  %s1113_s14 = sphi %s1154_s14, %s1308_s14   ;;  %s1109_s13 = sphi %s1152_s13, %s1307_s13   ;;  %s1105_s12 = sphi %s1150_s12, %s1306_s12  }
   0x4   : > { %s1175_s18 = sadd.s32 1, %s1117_s15   ;;  %s91_s19 = sadd.s32 1, %s1113_s14 }
   0x5   : > { %s88_s20 = ssub.s32 %s1117_s15, %s1175_s18  ;;  %p101_p0 = scmp.ne.s32.totalorder %s1113_s14, %s1109_s13 }
   0x6   : > { %p89_p1 = scmp.eq.s32.totalorder %s88_s20, 0  ;;  %p102_p2 = scmp.eq.s32.totalorder %s1171_s16, 1 }
   0x7   : > { %p107_p3 = scmp.ne.s32.totalorder %s1109_s13, %s1105_s12  ;;  %p108_p4 = scmp.eq.s32.totalorder %s926_s17, 1 }
   0x8   : > { %s1186_s21 = scalar_select %p89_p1, %s1113_s14, %s91_s19  }
   0x9   : > { %p1188_p5 = por %p102_p2, %p101_p0  ;;  %p1192_p6 = por %p108_p4, %p107_p3 }
   0xa   : > { %p929_p7 = scmp.ge.s32.totalorder %s1117_s15, 1  ;;  %p139_p8 = scmp.lt.s32.totalorder %s1117_s15, 3 }
   0xc   : > { %p140_p9 = pnand %p929_p7, %p139_p8 }
   0xd   : > { %v167_v0 = vld [vmem:[%s1301_s1] sm:$0xf] (!%p140_p9)  ;;  %vm172_vm0 = vcmask (!%p140_p9), 1043456   ;;  %p162_p10 = scmp.lt.s32.totalorder (!%p140_p9), %s1171_s16, 1  ;;  %v1119_v1 = vmov (!%p140_p9), 0.0   ;;  %vm1120_vm1 = vmmov (!%p140_p9), 0  }
   0xe   : > { %143 = sbr.rel (%p140_p9) target bundleno = 482 (0x1e2), region = 32  ;;  %974 = vmatprep.subr.mxu0 (!%p140_p9), %v1119_v1  ;;  %v174_v2 = vsel (!%p140_p9), %vm172_vm0, %v167_v0, 0  ;;  %976 = vmatprep.mubr.msk.f32.mxu0 (!%p140_p9), %vm1120_vm1, %v1119_v1  ;;  %vm168_vm2 = vcmask (!%p140_p9), 31744   ;;  %v932_v18 = vld [vmem:[%s1302_s2] ss:$0 sm:$0xff] (!%p140_p9)  ;;  %s159_s6 = sand.u32 (!%p140_p9), 1, %s1109_s13  }
   0xf   : > { %v177_v3 = vand.u32 (!%p140_p9), 4294901760, %v174_v2  ;;  %959 = vmatprep.subr.mxu1 (!%p140_p9), %v1119_v1  ;;  %961 = vmatprep.mubr.msk.f32.mxu1 (!%p140_p9), %vm1120_vm1, %v1119_v1  ;;  %v1121_v32 = vmov (!%p140_p9), 683565275   ;;  %v1122_v34 = vmov (!%p140_p9), 2475754826   ;;  %s930_s7 = sshll.u32 (!%p140_p9), %s159_s6, 4 }
  0x10   : > { %v1123_v37 = vmov (!%p140_p9), 2131351028   ;;  %v1124_v40 = vmov (!%p140_p9), 2102212464   ;;  %v1125_v43 = vmov (!%p140_p9), 920167782  }
  0x11   : > { %v254_v4 = vsub.f32 (!%p140_p9), %v174_v2, %v177_v3  ;;  %975 = vmatpush3.msra.mxu0 (!%p140_p9), %v177_v3  ;;  %960 = vmatpush3.msra.mxu1 (!%p140_p9), %v177_v3  ;;  %v1126_v46 = vmov (!%p140_p9), 1326507024   ;;  %s1242_s8 = scalar_lea.vmem (!%p140_p9), [#allocation2], %s930_s7  ;;  %s1127_s9 = smov (!%p140_p9), 4  }
  0x12   : > { %964 = vmatprep.subr.mxu1 (!%p140_p9), %v1119_v1  ;;  %979 = vmatprep.subr.mxu0 (!%p140_p9), %v1119_v1  ;;  %s1128_s10 = smov (!%p140_p9), 84   ;;  %s946_s11 = sshll.u32 (!%p140_p9), %s1171_s16, 8 }
  0x13   : > { %v255_v7 = vand.u32 (!%p140_p9), 4294901760, %v254_v4  ;;  %s867_s17 = sshll.u32 (!%p140_p9), %s1242_s8, 4  ;;  %s1254_s24 = scalar_lea.hbm (!%p140_p9), %s1303_s3, %s946_s11  ;;  %s1256_s17 = int_to_ptr.vmem [resolvable:$true] %s867_s17 }
  0x14   : > { %s853_s25 = scalar_lea.sflag (!%p140_p9), [#allocation3], %s159_s6 }
  0x15   : > { %s163_s26 = scalar_select %p162_p10, %s1171_s16, 1  ;;  %v256_v10 = vsub.f32 %v254_v4, %v255_v7 }
  0x16   : > { %s1055_s16 = scalar_lea.vmem %s1256_s17, 256 }
  0x17   : > { %s931_s27 = sshll.u32 %s163_s26, 3  ;;  %v257_v13 = vand.u32 4294901760, %v256_v10  ;;  %p1056_p11 = scmp.ne.s32.totalorder %s1256_s17, %s1055_s16 }
  0x18   : > { %s165_s30 = scalar_lea.vmem %s1300_s0, %s931_s27  ;;  %s1129_s26 = smov [#allocation2]  }
  0x19   : > { %v1208_v5 = vld [vmem:[%s165_s30] sm:$0xff]  ;;  %p1057_p12 = pnand %p1056_p11, %p1188_p5  ;;  %s1059_s27 = sshll.u32 %s1129_s26, 4  ;;  %s1060_s27 = int_to_ptr.vmem [resolvable:$false] %s1059_s27 }
  0x1a   : > { %v170_v6 = vsel %vm168_vm2, %v1208_v5, 0  ;;  %630 = vst.msk [vmem:[%s1242_s8] sm:$0xff] %vm168_vm2, %v1208_v5  ;;  %s1061_s28 = scalar_lea.vmem %s1060_s27, 512  ;;  %p1062_p0 = scmp.lt.s32.totalorder %s1256_s17, %s1060_s27 }
  0x1b   : > { %v242_v8 = vand.u32 4294901760, %v170_v6  ;;  %p1058_p13 = pneg %p1057_p12  ;;  %p1063_p1 = scmp.lt.s32.totalorder %s1061_s28, %s1055_s16 }
  0x1d   : > { %v243_v9 = vsub.f32 %v170_v6, %v242_v8  ;;  %p1064_p2 = por %p1063_p1, %p1062_p0 }
  0x1f   : > { %v244_v11 = vand.u32 4294901760, %v243_v9  ;;  %p1065_p3 = pnand %p1064_p2, %p1058_p13 }
  0x21   : > { %977 = vmatmul.mubr.f32.vlgmr.msra.gmra.mrb[0].mxu0 %v244_v11  ;;  %v245_v12 = vsub.f32 %v243_v9, %v244_v11 }
  0x22   : > { %980 = vmatpush3.msra.mxu0 %v255_v7  ;;  %981 = vmatprep.mubr.msk.f32.mxu0 %vm1120_vm1, %v1119_v1 }
  0x23   : > { %v246_v14 = vand.u32 4294901760, %v245_v12  ;;  %984 = vmatprep.subr.mxu0 %v1119_v1 }
  0x25   : > { %962 = vmatmul.mubr.f32.vlgmr.msra.gmra.mrb[0].mxu1 %v246_v14 }
  0x26   : > { %965 = vmatpush3.msra.mxu1 %v257_v13  ;;  %966 = vmatprep.mubr.msk.f32.mxu1 %vm1120_vm1, %v1119_v1 }
  0x27   : > { %969 = vmatprep.subr.mxu1 %v1119_v1 }
  0x29   : > { %982 = vmatmul.mubr.f32.vlgmr.msra.gmra.mrb[0].mxu0 %v242_v8 }
  0x2a   : > { %985 = vmatpush3.msra.mxu0 %v177_v3  ;;  %986 = vmatprep.mubr.msk.f32.mxu0 %vm1120_vm1, %v1119_v1 }
  0x2d   : > { %967 = vmatmul.mubr.f32.vlgmr.msra.gmra.mrb[0].mxu1 %v242_v8 }
  0x2e   : > { %970 = vmatpush3.msra.mxu1 %v254_v4  ;;  %971 = vmatprep.mubr.msk.f32.mxu1 %vm1120_vm1, %v1119_v1 }
  0x31   : > { %987 = vmatmul.mubr.f32.vlgmr.msra.gmra.mrb[0].mxu0 %v242_v8 }
  0x35   : > { %972 = vmatmul.mubr.f32.vlgmr.msra.gmra.mrb[0].mxu1 %v243_v9 }
 0x104   : > { %v618_v15 = vpop.f32.mrb[0].mxu0 }
 0x105   : > { %v988_v16 = vpop.f32.mrb[1].mxu0 }
 0x108   : > { %v398_v17 = vpop.f32.mrb[0].mxu1 }
 0x109   : > { %v989_v19 = vadd.f32 %v618_v15, %v398_v17  ;;  %v973_v20 = vpop.f32.mrb[1].mxu1 }
 0x10b   : > { %v1219_v21 = vmul.f32 %v989_v19, %v932_v18 }
 0x10d   : > { %v634_v22 = vand.u32 2139095040, %v1219_v21  ;;  %v631_v26 = vand.u32 2147483647, %v1219_v21  ;;  %vm633_vm10 = vcmp.lt.s32.totalorder %v1219_v21, 0  ;;  %vm723_vm2 = vweird.f32 %v1219_v21 }
 0x10f   : > { %v635_v23 = vshrl.u32 %v634_v22, 23  ;;  %v638_v30 = vand.u32 8388607, %v631_v26  ;;  %vm632_vm11 = vcmp.le.f32.partialorder %v631_v26, 0.7853982 }
 0x111   : > { %v933_v24 = vadd.s32 4294967169, %v635_v23  ;;  %v639_v48 = vor.u32 8388608, %v638_v30 }
 0x113   : > { %v641_v25 = vadd.s32 1, %v933_v24  ;;  %v679_v62 = vshll.u32 %v639_v48, 8 }
 0x115   : > { %vm642_vm3 = vcmp.gt.s32.totalorder %v641_v25, 0 }
 0x116   : > { %v643_v27 = vsel %vm642_vm3, %v641_v25, 0  ;;  %vm739_vm3 = vcmask 687136  }
 0x117   : > { %v645_v28 = vand.u32 31, %v643_v27  ;;  %v644_v31 = vshrl.u32 %v643_v27, 5 }
 0x119   : > { %v646_v29 = vsub.s32 32, %v645_v28  ;;  %v648_v33 = vshll.u32 %v1121_v32, %v645_v28  ;;  %v651_v35 = vshll.u32 %v1122_v34, %v645_v28  ;;  %v654_v39 = vshll.u32 %v1123_v37, %v645_v28 }
 0x11a   : > { %v657_v42 = vshll.u32 %v1124_v40, %v645_v28  ;;  %v660_v45 = vshll.u32 %v1125_v43, %v645_v28  ;;  %vm663_vm4 = vcmp.lt.s32.totalorder %v644_v31, 1  ;;  %vm666_vm5 = vcmp.lt.s32.totalorder %v644_v31, 4 }
 0x11b   : > { %v649_v36 = vshrl.u32 %v1122_v34, %v646_v29  ;;  %v652_v38 = vshrl.u32 %v1123_v37, %v646_v29  ;;  %v655_v41 = vshrl.u32 %v1124_v40, %v646_v29  ;;  %v658_v44 = vshrl.u32 %v1125_v43, %v646_v29 }
 0x11c   : > { %v661_v47 = vshrl.u32 %v1126_v46, %v646_v29  ;;  %v647_v57 = vshrl.u32 %v1121_v32, %v646_v29  ;;  %vm665_vm6 = vcmp.lt.s32.totalorder %v644_v31, 3  ;;  %vm664_vm7 = vcmp.lt.s32.totalorder %v644_v31, 2 }
 0x11d   : > { %v650_v49 = vor.u32 %v649_v36, %v648_v33  ;;  %v653_v50 = vor.u32 %v652_v38, %v651_v35  ;;  %v656_v51 = vor.u32 %v655_v41, %v654_v39  ;;  %v659_v52 = vor.u32 %v658_v44, %v657_v42 }
 0x11e   : > { %v662_v53 = vor.u32 %v661_v47, %v660_v45 }
 0x11f   : > { %v668_v54 = vsel %vm666_vm5, %v656_v51, 2102212464  ;;  %v671_v55 = vsel %vm663_vm4, %v650_v49, %v653_v50  ;;  %v675_v56 = vsel %vm663_vm4, %v653_v50, %v656_v51  ;;  %v672_v58 = vsel %vm666_vm5, %v659_v52, 920167782 }
 0x120   : > { %v676_v59 = vsel %vm666_vm5, %v662_v53, 1326507024  ;;  %v673_v60 = vsel %vm665_vm6, %v656_v51, %v672_v58  ;;  %v667_v63 = vsel %vm663_vm4, %v647_v57, %v650_v49  ;;  %v669_v0 = vsel %vm665_vm6, %v653_v50, %v668_v54 }
 0x121   : > { %v677_v61 = vsel %vm665_vm6, %v659_v52, %v676_v59  ;;  %v674_v1 = vsel %vm664_vm7, %v671_v55, %v673_v60  ;;  %v670_v8 = vsel %vm664_vm7, %v667_v63, %v669_v0  ;;  %vm848_vm4 = vcmask 1048224  }
 0x122   : > { %v678_v2 = vsel %vm664_vm7, %v675_v56, %v677_v61  ;;  %v1228_v6 = vmul.u32.u64.low %v679_v62, %v674_v1  ;;  %v1229_v7 = vmul.u32.u64.high %v679_v62, %v674_v1, %v1228_v6  ;;  %v686_v10 = vmul.u32 %v679_v62, %v670_v8 }
 0x123   : > { %v1225_v3 = vmul.u32.u64.low %v679_v62, %v678_v2  ;;  %v1226_v4 = vmul.u32.u64.high %v679_v62, %v678_v2, %v1225_v3  ;;  %vm850_vm5 = vcmask 293888  }
 0x124   : > { %v689_v9 = vadd.s32 1, %v1229_v7 }
 0x125   : > { %vm688_vm8 = vc.u32 %v1226_v4, %v1228_v6  ;;  %v687_v23 = vadd.s32 %v1228_v6, %v1226_v4 }
 0x126   : > { %v690_v11 = vsel %vm688_vm8, %v689_v9, %v1229_v7 }
 0x127   : > { %v691_v12 = vadd.s32 %v690_v11, %v686_v10 }
 0x129   : > { %v692_v13 = vadd.s32 536870912, %v691_v12 }
 0x12b   : > { %v693_v14 = vshrl.u32 %v692_v13, 30 }
 0x12d   : > { %v694_v15 = vshll.u32 %v693_v14, 30  ;;  %v717_v36 = vsub.s32 4, %v693_v14 }
 0x12f   : > { %v695_v16 = vsub.s32 %v691_v12, %v694_v15  ;;  %v718_v39 = vsel %vm633_vm10, %v717_v36, %v693_v14 }
 0x130   : > { %v720_v41 = vsel %vm632_vm11, 0, %v718_v39 }
 0x131   : > { %v697_v17 = vsub.s32 0, %v695_v16  ;;  %v724_v42 = vadd.s32 3, %v720_v41  ;;  %v834_v44 = vand.u32 3, %v720_v41 }
 0x133   : > { %v934_v18 = vmin.u32 %v697_v17, %v695_v16  ;;  %v725_v43 = vand.u32 3, %v724_v42  ;;  %vm839_vm13 = vcmp.eq.s32.totalorder %v834_v44, 2  ;;  %vm836_vm15 = vcmp.eq.s32.totalorder %v834_v44, 0 }
 0x134   : > { %vm835_vm1 = vcmp.lt.s32.totalorder %v834_v44, 2 }
 0x135   : > { %v699_v19 = vclz %v934_v18  ;;  %vm730_vm12 = vcmp.eq.s32.totalorder %v725_v43, 2  ;;  %vm727_vm14 = vcmp.eq.s32.totalorder %v725_v43, 0  ;;  %vm726_vm0 = vcmp.lt.s32.totalorder %v725_v43, 2 }
 0x137   : > { %v935_v20 = vadd.s32 4294967294, %v699_v19 }
 0x139   : > { %vm936_vm9 = vcmp.lt.s32.totalorder %v935_v20, 0 }
 0x13a   : > { %v702_v22 = vsel %vm936_vm9, 0, %v935_v20 }
 0x13b   : > { %v703_v24 = vsub.s32 32, %v702_v22  ;;  %v707_v25 = vsub.s32 4294967266, %v702_v22  ;;  %v704_v27 = vshll.u32 %v695_v16, %v702_v22 }
 0x13d   : > { %v705_v28 = vshrl.u32 %v687_v23, %v703_v24  ;;  %v708_v29 = vadd.s32 127, %v707_v25 }
 0x13f   : > { %v706_v30 = vor.u32 %v705_v28, %v704_v27  ;;  %v709_v31 = vshll.u32 %v708_v29, 23 }
 0x141   : > { %v710_v32 = vor.u32 4788187, %v709_v31  ;;  %v713_v34 = vcvt.s32.f32 %v706_v30 }
 0x143   : > { %v711_v33 = vand.u32 2147483647, %v710_v32 }
 0x145   : > { %v714_v35 = vmul.f32 %v713_v34, %v711_v33 }
 0x147   : > { %v715_v37 = vxor.u32 2147483648, %v714_v35 }
 0x149   : > { %v716_v38 = vsel %vm633_vm10, %v715_v37, %v714_v35 }
 0x14a   : > { %v719_v40 = vsel %vm632_vm11, %v1219_v21, %v716_v38 }
 0x14b   : > { %1051 = vcosq.f32 %v719_v40 }
 0x14c   : > { %1053 = vsinq.f32 %v719_v40 }
 0x155   : > { %v1052_v26 = vpop.eup %1051 }
 0x156   : > { %v1054_v45 = vpop.eup %1053  ;;  %v731_v46 = vxor.u32 2147483648, %v1052_v26 }
 0x157   : > { %v728_v47 = vxor.u32 2147483648, %v1054_v45 }
 0x158   : > { %v732_v48 = vsel %vm730_vm12, %v731_v46, %v1054_v45  ;;  %v841_v49 = vsel %vm839_vm13, %v731_v46, %v1054_v45 }
 0x159   : > { %v729_v50 = vsel %vm727_vm14, %v1052_v26, %v728_v47  ;;  %v838_v51 = vsel %vm836_vm15, %v1052_v26, %v728_v47 }
 0x15a   : > { %v733_v5 = vsel %vm726_vm0, %v729_v50, %v732_v48  ;;  %v842_v52 = vsel %vm835_vm1, %v838_v51, %v841_v49 }
 0x15b   : > { %v734_v53 = vsel %vm723_vm2, nan, %v733_v5  ;;  %v843_v54 = vsel %vm723_vm2, nan, %v842_v52 }
 0x15c   : > { %736 = vrot.lane.b32.xlu0 %v734_v53, %s1127_s9 }
 0x160   : > { %845 = vrot.lane.b32.xlu0 %v843_v54, %s1128_s10 }
 0x1ce   : > { %v737_v55 = vpop.permute.xlu0 %736 }
 0x1cf   : > { %740 = vst.msk [vmem:[%s1242_s8] sm:$0xff] %vm739_vm3, %v737_v55 }
 0x1d2   : > { %v846_v21 = vpop.permute.xlu0 %845 }
 0x1d3   : > { %849 = vst.msk [vmem:[%s1242_s8] sm:$0xff] %vm848_vm4, %v846_v21 }
 0x1d4   : > { %851 = vst.msk [vmem:[%s1242_s8 + $0x8] sm:$0xff] %vm850_vm5, %v846_v21 }
 0x1d5   : > { %1068 = shalt.err (!%p1065_p3)
}
 0x1d6   : > { %s1069_s29 = scalar_lea.hbm %s1254_s24, 256  ;;  %s1073_s5 = scalar_lea.hbm %s1303_s3, 512 }
 0x1d7   : > { %p1070_p4 = scmp.ne.s32.totalorder %s1254_s24, %s1069_s29  ;;  %p1074_p9 = scmp.lt.u32.totalorder %s1254_s24, %s1303_s3 }
 0x1d8   : > { %p1075_p10 = scmp.lt.u32.totalorder %s1073_s5, %s1069_s29  ;;  %p1077_p12 = scmp.lt.u32.totalorder %s1069_s29, %s1254_s24 }
 0x1d9   : > { %p1071_p7 = pnand %p1070_p4, %p1188_p5 }
 0x1da   : > { %p1076_p11 = por %p1075_p10, %p1074_p9 }
 0x1db   : > { %p1072_p8 = pneg %p1071_p7 }
 0x1dc   : > { %p1078_p13 = por %p1077_p12, %p1076_p11 }
 0x1de   : > { %p1079_p0 = pnand %p1078_p13, %p1072_p8 }
 0x1e0   : > { %1082 = shalt.err (!%p1079_p0)
}
 0x1e1   : > { %1002 = dma.vmem_to_hbm [thread:$0]  (%p1188_p5), %s1256_s17, 256, %s1254_s24, %s853_s25  }
 0x1e2 PF: > { %p1008_p1 = scmp.ge.s32.totalorder %s1117_s15, 2  ;;  %s879_s8 = sand.u32 1, %s1105_s12  }
 0x1e3   : > { %s880_s9 = scalar_lea.sflag [#allocation3], %s879_s8 }
 0x1e4   : > { %p1005_p2 = pnand %p1008_p1, %p1192_p6 }
 0x1e6   : > { %1100 = dma.done.wait (!%p1005_p2), %s880_s9, 256  }
 0x1e7   : > { %1102 = vsyncadd (!%p1005_p2), %s880_s9, 4294967040  ;;  %p13_p3 = scmp.ge.s32.totalorder %s1175_s18, 4   ;;  %s1306_s12 = smov %s1109_s13 }
 0x1e8   : > { %s1307_s13 = smov %s1113_s14  ;;  %s1308_s14 = smov %s1186_s21 }
 0x1e9   : > { %s1309_s15 = smov %s1175_s18  ;;  %15 = sbr.rel (!%p13_p3) target bundleno = 3 (0x3), region = 67 }
 0x1f0   :  { %885 = vsyncpa [#allocation3], 1 }
 0x1f1   :  { %887 = vsyncpa [#allocation3 + $0x1], 1 }

</bundles_post_ra>
